<compile_context>
chip_gen: v7x
topology: tpu7x:2x2x1
jax: 0.10.0
libtpu: 0.0.40
codegen_flags: <defaults>
</compile_context>

<pallas_src>
import functools

import jax
import jax.numpy as jnp
import numpy as np
from jax import lax
from jax.experimental import pallas as pl
from jax.experimental.pallas import tpu as pltpu


def _nt_xent_kernel(z_row_ref, z_par_ref, z_col_ref, out_ref, denom_acc,
                    *, inv_temp, eps):
    r = pl.program_id(0)
    c = pl.program_id(1)
    nc = pl.num_programs(1)

    @pl.when(c == 0)
    def _init():
        denom_acc[...] = jnp.zeros_like(denom_acc)

    # Cosine normalization (F.normalize eps=1e-12: x / max(||x||, eps)),
    # using rsqrt (EUP) and folding 1/temp into the row operand only
    # (moves the N^2 multiply down to N*C).
    zr = z_row_ref[...]
    zr_n = zr * lax.rsqrt(
        jnp.maximum(jnp.sum(zr * zr, axis=-1, keepdims=True), eps * eps))
    zc = z_col_ref[...]
    zc_n = zc * lax.rsqrt(
        jnp.maximum(jnp.sum(zc * zc, axis=-1, keepdims=True), eps * eps))

    # bf16 MXU operands, f32 accumulation.
    a = (zr_n * inv_temp).astype(jnp.bfloat16)
    b = zc_n.astype(jnp.bfloat16)
    sim = lax.dot_general(
        a, b,
        dimension_numbers=(((1,), (1,)), ((), ())),
        preferred_element_type=jnp.float32)                 # (T, T) f32

    e = jnp.exp(sim)                                        # EUP

    # Denominator accumulation: exclude the self-similarity diagonal, which only
    # exists on tiles where row_tile == col_tile (square T x T tiling of N).
    @pl.when(r == c)
    def _diag_tile():
        rl = lax.broadcasted_iota(jnp.int32, e.shape, 0)
        cl = lax.broadcasted_iota(jnp.int32, e.shape, 1)
        denom_acc[...] += jnp.sum(jnp.where(rl == cl, 0.0, e),
                                  axis=1, keepdims=True)

    @pl.when(r != c)
    def _off_diag_tile():
        denom_acc[...] += jnp.sum(e, axis=1, keepdims=True)

    @pl.when(c == nc - 1)
    def _finalize():
        # Positive logit: RAW (un-normalized) dot product between each row and its
        # partner row (i + B) mod N — exactly what the PyTorch module computes
        # from z_i, z_j before normalization.
        pos = jnp.sum(z_row_ref[...] * z_par_ref[...], axis=-1,
                      keepdims=True) * inv_temp
        out_ref[...] = jnp.log(denom_acc[...]) - pos        # per-row loss terms


def _pick_tile(batch, max_tile=256):
    """Largest multiple of 8 that divides `batch` and is <= max_tile."""
    t = 0
    for cand in range(8, min(batch, max_tile) + 1, 8):
        if batch % cand == 0:
            t = cand
    return t


def nt_xent_loss(z_i, z_j, temp=0.5):
    """Pallas implementation of NTXentLoss.forward(z_i, z_j)."""
    assert z_i.shape == z_j.shape and z_i.ndim == 2
    B, C = z_i.shape
    N = 2 * B
    # TODO(synk): pad + column-mask for batch sizes that are not a multiple of 8
    # (sublane granularity); typical SimCLR batches satisfy this.
    assert B % 8 == 0, "batch size must be a multiple of 8"
    T = _pick_tile(B)
    n_tiles = N // T
    par_shift = B // T            # partner of row tile r is tile (r + B/T) mod (N/T)

    # Glue: concatenate the two views. One O(N*C) HBM pass, accepted knowingly —
    # the kernel's O(N^2*C) matmul dominates at real sizes.
    z = jnp.concatenate([z_i, z_j], axis=0).astype(jnp.float32)

    kernel = functools.partial(_nt_xent_kernel,
                               inv_temp=1.0 / float(temp), eps=1e-12)

    per_row = pl.pallas_call(
        kernel,
        out_shape=jax.ShapeDtypeStruct((N, 1), jnp.float32),
        grid=(n_tiles, n_tiles),
        in_specs=[
            # anchor rows (raw)
            pl.BlockSpec((T, C), lambda r, c: (r, 0)),
            # partner rows (raw), for the positive logit; index does not depend
            # on c, so the DMA is only re-issued when the row tile changes.
            pl.BlockSpec((T, C), lambda r, c: ((r + par_shift) % n_tiles, 0)),
            # candidate columns (raw), streamed along the reduction axis
            pl.BlockSpec((T, C), lambda r, c: (c, 0)),
        ],
        out_specs=pl.BlockSpec((T, 1), lambda r, c: (r, 0)),
        scratch_shapes=[pltpu.VMEM((T, 1), jnp.float32)],
        compiler_params=pltpu.CompilerParams(
            dimension_semantics=("parallel", "arbitrary")),
    )(z, z, z)

    return jnp.mean(per_row[:, 0])


def _nt_xent_ref(z_i, z_j, temp):
    """Pure-JAX reference mirroring the PyTorch module literally."""
    B = z_i.shape[0]
    N = 2 * B
    z = jnp.concatenate([z_i, z_j], axis=0)
    zn = z / jnp.maximum(jnp.linalg.norm(z, axis=1, keepdims=True), 1e-12)
    sim = (zn @ zn.T) / temp
    pos = jnp.sum(z_i * z_j, axis=-1) / temp
    pos = jnp.concatenate([pos, pos], axis=0)
    mask = 1.0 - jnp.eye(N, dtype=jnp.float32)
    denom = jnp.sum(jnp.exp(sim) * mask, axis=1)
    loss = -jnp.log(jnp.exp(pos) / denom)
    return jnp.mean(loss)


if __name__ == "__main__":
    key = jax.random.PRNGKey(0)
    cases = [
        (8, 32, 0.5),      # small shapes consistent with the module's [N, D] inputs
        (64, 128, 0.5),    # lane-dense tiles (T=64, C=128); exercises the 2x2 grid
    ]
    ok = True
    for B, C, temp in cases:
        key, k1, k2 = jax.random.split(key, 3)
        z_i = 0.5 * jax.random.normal(k1, (B, C), dtype=jnp.float32)
        z_j = 0.5 * jax.random.normal(k2, (B, C), dtype=jnp.float32)

        loss = jax.block_until_ready(nt_xent_loss(z_i, z_j, temp))
        ref = jax.block_until_ready(_nt_xent_ref(z_i, z_j, temp))

        # bf16 MXU operands -> loosened tolerance vs the f32 reference.
        if not np.allclose(np.asarray(loss), np.asarray(ref),
                           rtol=2e-2, atol=5e-2):
            ok = False
            print("MISMATCH", (B, C), float(loss), float(ref))

    if ok:
        print("KERNEL_OK")
</pallas_src>

<mosaic_0001>
module attributes {stable_mosaic.version = 11 : i64} {
  func.func @_nt_xent_kernel(%arg0: i32, %arg1: i32, %arg2: memref<8x32xf32, #tpu.memory_space<vmem>>, %arg3: memref<8x32xf32, #tpu.memory_space<vmem>>, %arg4: memref<8x32xf32, #tpu.memory_space<vmem>>, %arg5: memref<8x1xf32, #tpu.memory_space<vmem>>, %arg6: memref<8x1xf32, #tpu.memory_space<vmem>>) attributes {dimension_semantics = [#tpu.dimension_semantics<parallel>, #tpu.dimension_semantics<arbitrary>], iteration_bounds = array<i64: 2, 2>, scalar_prefetch = 0 : i64, scratch_operands = 1 : i64, tpu.core_type = #tpu.core_type<tc>, window_params = [{transform_indices = @transform_0, window_bounds = array<i64: 8, 32>}, {transform_indices = @transform_1, window_bounds = array<i64: 8, 32>}, {transform_indices = @transform_2, window_bounds = array<i64: 8, 32>}, {transform_indices = @transform_3, window_bounds = array<i64: 8, 1>}]} {
    %c0_i32 = arith.constant 0 : i32
    %0 = arith.cmpi eq, %arg1, %c0_i32 : i32
    %1 = arith.extui %0 : i1 to i32
    %c0_i32_0 = arith.constant 0 : i32
    %2 = arith.cmpi ne, %1, %c0_i32_0 : i32
    scf.if %2 {
      %cst_12 = arith.constant 0.000000e+00 : f32
      %36 = vector.broadcast %cst_12 : f32 to vector<8x1xf32>
      %c0_13 = arith.constant 0 : index
      %c0_14 = arith.constant 0 : index
      %37 = vector.load %arg6[%c0_13, %c0_14] : memref<8x1xf32, #tpu.memory_space<vmem>>, vector<8x1xf32>
      tpu.vector_store %arg6[%c0_13, %c0_14], %36 {strides = array<i32>} : memref<8x1xf32, #tpu.memory_space<vmem>>, vector<8x1xf32>,
    } else {
    }
    %c0 = arith.constant 0 : index
    %c0_1 = arith.constant 0 : index
    %3 = vector.load %arg2[%c0, %c0_1] : memref<8x32xf32, #tpu.memory_space<vmem>>, vector<8x32xf32>
    %4 = arith.mulf %3, %3 : vector<8x32xf32>
    %cst = arith.constant dense<0.000000e+00> : vector<8xf32>
    %5 = vector.multi_reduction <add>, %4, %cst [1] : vector<8x32xf32> to vector<8xf32>
    %6 = vector.shape_cast %5 : vector<8xf32> to vector<8x1xf32>
    %cst_2 = arith.constant 1.000000e-24 : f32
    %7 = vector.broadcast %cst_2 : f32 to vector<8x1xf32>
    %8 = arith.maximumf %6, %7 : vector<8x1xf32>
    %9 = math.rsqrt %8 : vector<8x1xf32>
    %10 = vector.broadcast %9 : vector<8x1xf32> to vector<8x32xf32>
    %11 = arith.mulf %3, %10 : vector<8x32xf32>
    %c0_3 = arith.constant 0 : index
    %c0_4 = arith.constant 0 : index
    %12 = vector.load %arg4[%c0_3, %c0_4] : memref<8x32xf32, #tpu.memory_space<vmem>>, vector<8x32xf32>
    %13 = arith.mulf %12, %12 : vector<8x32xf32>
    %cst_5 = arith.constant dense<0.000000e+00> : vector<8xf32>
    %14 = vector.multi_reduction <add>, %13, %cst_5 [1] : vector<8x32xf32> to vector<8xf32>
    %15 = vector.shape_cast %14 : vector<8xf32> to vector<8x1xf32>
    %cst_6 = arith.constant 1.000000e-24 : f32
    %16 = vector.broadcast %cst_6 : f32 to vector<8x1xf32>
    %17 = arith.maximumf %15, %16 : vector<8x1xf32>
    %18 = math.rsqrt %17 : vector<8x1xf32>
    %19 = vector.broadcast %18 : vector<8x1xf32> to vector<8x32xf32>
    %20 = arith.mulf %12, %19 : vector<8x32xf32>
    %cst_7 = arith.constant 2.000000e+00 : f32
    %21 = vector.broadcast %cst_7 : f32 to vector<8x32xf32>
    %22 = arith.mulf %11, %21 : vector<8x32xf32>
    %23 = arith.truncf %22 : vector<8x32xf32> to vector<8x32xbf16>
    %24 = arith.truncf %20 : vector<8x32xf32> to vector<8x32xbf16>
    %cst_8 = arith.constant dense<0.000000e+00> : vector<8x8xf32>
    %25 = tpu.matmul %23, %24, %cst_8 {dimension_numbers = #tpu.dot_dimension_numbers<[1], [1], [0], [0], [0, 0, 1, 0], [], []>} : vector<8x32xbf16>, vector<8x32xbf16>, vector<8x8xf32> -> vector<8x8xf32>
    %26 = math.exp %25 : vector<8x8xf32>
    %27 = arith.cmpi eq, %arg0, %arg1 : i32
    %28 = arith.extui %27 : i1 to i32
    %c0_i32_9 = arith.constant 0 : i32
    %29 = arith.cmpi ne, %28, %c0_i32_9 : i32
    scf.if %29 {
      %36 = tpu.iota {dimensions = array<i32: 0>} : vector<8x8xi32>
      %37 = tpu.iota {dimensions = array<i32: 1>} : vector<8x8xi32>
      %c0_12 = arith.constant 0 : index
      %c0_13 = arith.constant 0 : index
      %38 = vector.load %arg6[%c0_12, %c0_13] : memref<8x1xf32, #tpu.memory_space<vmem>>, vector<8x1xf32>
      %39 = arith.cmpi eq, %36, %37 : vector<8x8xi32>
      %cst_14 = arith.constant 0.000000e+00 : f32
      %40 = vector.broadcast %cst_14 : f32 to vector<8x8xf32>
      %41 = arith.select %39, %40, %26 : vector<8x8xi1>, vector<8x8xf32>
      %cst_15 = arith.constant dense<0.000000e+00> : vector<8xf32>
      %42 = vector.multi_reduction <add>, %41, %cst_15 [1] : vector<8x8xf32> to vector<8xf32>
      %43 = vector.shape_cast %42 : vector<8xf32> to vector<8x1xf32>
      %44 = arith.addf %38, %43 : vector<8x1xf32>
      %c0_16 = arith.constant 0 : index
      %c0_17 = arith.constant 0 : index
      %45 = vector.load %arg6[%c0_16, %c0_17] : memref<8x1xf32, #tpu.memory_space<vmem>>, vector<8x1xf32>
      tpu.vector_store %arg6[%c0_16, %c0_17], %44 {strides = array<i32>} : memref<8x1xf32, #tpu.memory_space<vmem>>, vector<8x1xf32>,
    } else {
    }
    %30 = arith.cmpi ne, %arg0, %arg1 : i32
    %31 = arith.extui %30 : i1 to i32
    %c0_i32_10 = arith.constant 0 : i32
    %32 = arith.cmpi ne, %31, %c0_i32_10 : i32
    scf.if %32 {
      %c0_12 = arith.constant 0 : index
      %c0_13 = arith.constant 0 : index
      %36 = vector.load %arg6[%c0_12, %c0_13] : memref<8x1xf32, #tpu.memory_space<vmem>>, vector<8x1xf32>
      %cst_14 = arith.constant dense<0.000000e+00> : vector<8xf32>
      %37 = vector.multi_reduction <add>, %26, %cst_14 [1] : vector<8x8xf32> to vector<8xf32>
      %38 = vector.shape_cast %37 : vector<8xf32> to vector<8x1xf32>
      %39 = arith.addf %36, %38 : vector<8x1xf32>
      %c0_15 = arith.constant 0 : index
      %c0_16 = arith.constant 0 : index
      %40 = vector.load %arg6[%c0_15, %c0_16] : memref<8x1xf32, #tpu.memory_space<vmem>>, vector<8x1xf32>
      tpu.vector_store %arg6[%c0_15, %c0_16], %39 {strides = array<i32>} : memref<8x1xf32, #tpu.memory_space<vmem>>, vector<8x1xf32>,
    } else {
    }
    %c1_i32 = arith.constant 1 : i32
    %33 = arith.cmpi eq, %arg1, %c1_i32 : i32
    %34 = arith.extui %33 : i1 to i32
    %c0_i32_11 = arith.constant 0 : i32
    %35 = arith.cmpi ne, %34, %c0_i32_11 : i32
    scf.if %35 {
      %c0_12 = arith.constant 0 : index
      %c0_13 = arith.constant 0 : index
      %36 = vector.load %arg2[%c0_12, %c0_13] : memref<8x32xf32, #tpu.memory_space<vmem>>, vector<8x32xf32>
      %c0_14 = arith.constant 0 : index
      %c0_15 = arith.constant 0 : index
      %37 = vector.load %arg3[%c0_14, %c0_15] : memref<8x32xf32, #tpu.memory_space<vmem>>, vector<8x32xf32>
      %38 = arith.mulf %36, %37 : vector<8x32xf32>
      %cst_16 = arith.constant dense<0.000000e+00> : vector<8xf32>
      %39 = vector.multi_reduction <add>, %38, %cst_16 [1] : vector<8x32xf32> to vector<8xf32>
      %40 = vector.shape_cast %39 : vector<8xf32> to vector<8x1xf32>
      %cst_17 = arith.constant 2.000000e+00 : f32
      %41 = vector.broadcast %cst_17 : f32 to vector<8x1xf32>
      %42 = arith.mulf %40, %41 : vector<8x1xf32>
      %c0_18 = arith.constant 0 : index
      %c0_19 = arith.constant 0 : index
      %43 = vector.load %arg6[%c0_18, %c0_19] : memref<8x1xf32, #tpu.memory_space<vmem>>, vector<8x1xf32>
      %44 = math.log %43 : vector<8x1xf32>
      %45 = arith.subf %44, %42 : vector<8x1xf32>
      %c0_20 = arith.constant 0 : index
      %c0_21 = arith.constant 0 : index
      %46 = vector.load %arg5[%c0_20, %c0_21] : memref<8x1xf32, #tpu.memory_space<vmem>>, vector<8x1xf32>
      tpu.vector_store %arg5[%c0_20, %c0_21], %45 {strides = array<i32>} : memref<8x1xf32, #tpu.memory_space<vmem>>, vector<8x1xf32>,
    } else {
    }
    return
  }
  func.func @transform_0(%arg0: i32, %arg1: i32) -> (i32, i32) {
    %c0_i32 = arith.constant 0 : i32
    %c0_i32_0 = arith.constant 0 : i32
    return %arg0, %c0_i32 : i32, i32
  }
  func.func @transform_1(%arg0: i32, %arg1: i32) -> (i32, i32) {
    %c1_i32 = arith.constant 1 : i32
    %0 = arith.addi %arg0, %c1_i32 : i32
    %c2_i32 = arith.constant 2 : i32
    %c0_i32 = arith.constant 0 : i32
    %1 = arith.cmpi eq, %c2_i32, %c0_i32 : i32
    %c1_i32_0 = arith.constant 1 : i32
    %2 = arith.select %1, %c1_i32_0, %c2_i32 : i32
    %3 = arith.remsi %0, %2 : i32
    %c0_i32_1 = arith.constant 0 : i32
    %4 = arith.cmpi ne, %3, %c0_i32_1 : i32
    %c0_i32_2 = arith.constant 0 : i32
    %5 = arith.cmpi slt, %3, %c0_i32_2 : i32
    %c0_i32_3 = arith.constant 0 : i32
    %6 = arith.cmpi slt, %2, %c0_i32_3 : i32
    %7 = arith.xori %5, %6 : i1
    %8 = arith.andi %7, %4 : i1
    %9 = arith.addi %3, %2 : i32
    %10 = arith.select %8, %9, %3 : i32
    %c0_i32_4 = arith.constant 0 : i32
    %c0_i32_5 = arith.constant 0 : i32
    return %10, %c0_i32_4 : i32, i32
  }
  func.func @transform_2(%arg0: i32, %arg1: i32) -> (i32, i32) {
    %c0_i32 = arith.constant 0 : i32
    %c0_i32_0 = arith.constant 0 : i32
    return %arg1, %c0_i32 : i32, i32
  }
  func.func @transform_3(%arg0: i32, %arg1: i32) -> (i32, i32) {
    %c0_i32 = arith.constant 0 : i32
    %c0_i32_0 = arith.constant 0 : i32
    return %arg0, %c0_i32 : i32, i32
  }
}

</mosaic_0001>

<bundles_post_ra>
// kernel: tpu_custom_call.1
= control target key start
LH: loop header
LB: loop body
LE: loop exit
PB: predicated region body
PF: predicated region fallthrough
CT: control target
= control target key end

     0   :  { %s1360_s0 = inlined_call_operand.hbm [shape: f32[16,32], index: 0, kind: input, shape index: {}]   ;;  %s1361_s1 = inlined_call_operand.hbm [shape: f32[16,32], index: 1, kind: input, shape index: {}]   ;;  %s1362_s2 = inlined_call_operand.hbm [shape: f32[16,32], index: 2, kind: input, shape index: {}]   ;;  %s1363_s3 = inlined_call_operand.vmem [shape: f32[16,1], index: 3, kind: output, shape index: {}]  }
   0x1   :  { %1377 = sst [smem:[#allocation15_spill]] %s1362_s2 }
   0x2   :  { %1378 = sst [smem:[#allocation16_spill]] %s1363_s3 }
   0x3   :  { %8 = vsyncpa [#allocation4], 0 }
   0x4   :  { %10 = vsyncpa [#allocation4 + $0x1], 0 }
   0x5   :  { %11 = vsyncpa [#allocation6], 0 }
   0x6   :  { %13 = vsyncpa [#allocation6 + $0x1], 0  ;;  %s981_s12 = smov 0   ;;  %s983_s13 = smov 0  }
   0x7   :  { %s985_s14 = smov 0   ;;  %s987_s15 = smov 0  }
   0x8   :  { %s989_s16 = smov 0   ;;  %s991_s17 = smov 0  }
   0x9   :  { %s993_s18 = smov 0   ;;  %s995_s19 = smov 0  }
   0xa   :  { %s997_s20 = smov 0   ;;  %s999_s21 = smov 0  }
   0xb   :  { %s1001_s22 = smov 0   ;;  %s1003_s23 = smov 0  }
   0xc   :  { %s1005_s24 = smov 0   ;;  %s1007_s25 = smov 0  }
   0xd LB: > { %1379 = sst [smem:[#allocation11_spill]] %s917_s16  ;;  %s1364_s26 = sadd.s32 4294967295, %s953_s25   ;;  %s953_s25 = sphi %s1007_s25, %s19_s25   ;;  %s949_s24 = sphi %s1005_s24, %s1430_s24   ;;  %s945_s23 = sphi %s1003_s23, %s1429_s23   ;;  %s941_s22 = sphi %s1001_s22, %s1428_s22   ;;  %s937_s21 = sphi %s999_s21, %s1427_s21   ;;  %s933_s20 = sphi %s997_s20, %s1426_s20   ;;  %s929_s19 = sphi %s995_s19, %s1425_s19   ;;  %s925_s18 = sphi %s993_s18, %s1424_s18   ;;  %s921_s17 = sphi %s991_s17, %s1423_s17   ;;  %s917_s16 = sphi %s989_s16, %s1422_s16   ;;  %s913_s15 = sphi %s987_s15, %s1418_s15   ;;  %s909_s14 = sphi %s985_s14, %s1421_s14   ;;  %s905_s13 = sphi %s983_s13, %s1420_s13   ;;  %s901_s12 = sphi %s981_s12, %s1419_s12  }
   0xe   : > { %1380 = sst [smem:[#allocation12_spill]] %s937_s21  ;;  %s1365_s27 = sadd.s32 1, %s945_s23 }
   0xf   : > { %1381 = sst [smem:[#allocation13_spill]] %s941_s22  ;;  %p1055_p0 = scmp.ge.s32.totalorder %s1365_s27, 2 }
  0x10   : > { %s31_s29 = sadd.s32 1, %s949_s24  ;;  %p1372_p1 = scmp.eq.s32.totalorder %s953_s25, 0 }
  0x11   : > { %s1382_s28 = scalar_select %p1055_p0, 1, 0 }
  0x12   : > { %p1063_p2 = scmp.eq.s32.totalorder %s1364_s26, 0  ;;  %s63_s5 = ssub.s32 0, %s31_s29 }
  0x13   : > { %s32_s4 = scalar_select %p1055_p0, %s31_s29, %s949_s24 }
  0x14   : > { %s564_s6 = smin.u32 %s63_s5, %s31_s29  ;;  %s90_s8 = sadd.s32 1, %s921_s17 }
  0x15   : > { %p33_p3 = scmp.ge.s32.totalorder %s32_s4, 2  ;;  %s65_s7 = sand.u32 1, %s564_s6  }
  0x16   : > { %p97_p4 = scmp.ne.s32.totalorder %s921_s17, %s917_s16  ;;  %p566_p6 = scmp.lt.s32.totalorder %s65_s7, 0 }
  0x17   : > { %s1432_s4 = smov (%p33_p3, %s32_s4), 0  ;;  %s72_s11 = sadd.s32 2, %s65_s7 }
  0x18   : > { %s74_s9 = sadd.s32 1, %s1432_s4  ;;  %p1078_p5 = por %p97_p4, %p1372_p1 }
  0x19   : > { %s76_s26 = ssub.s32 0, %s74_s9  ;;  %s1434_s11 = smov (!%p566_p6, %s72_s11), %s65_s7 }
  0x1a   : > { %s567_s27 = smin.u32 %s76_s26, %s74_s9  ;;  %p103_p7 = scmp.ne.s32.totalorder %s917_s16, %s913_s15 }
  0x1b   : > { %s78_s29 = sand.u32 1, %s567_s27   ;;  %p1371_p9 = scmp.lt.s32.totalorder %s953_s25, 4 }
  0x1c   : > { %p1086_p8 = por %p103_p7, %p1063_p2  ;;  %s197_s6 = sand.u32 1, %s953_s25  }
  0x1d   : > { %p569_p10 = scmp.lt.s32.totalorder %s78_s29, 0  ;;  %s85_s21 = sadd.s32 2, %s78_s29 }
  0x1e   : > { %s1385_s5 = scalar_select %p1086_p8, 1, 0 }
  0x1f   : > { %s199_s3 = sand.u32 1, %s921_s17   ;;  %s1436_s21 = smov (!%p569_p10, %s85_s21), %s78_s29 }
  0x20   : > { %1386 = sst [smem:[#allocation14_spill]] %s1385_s5  ;;  %s574_s22 = sshll.u32 %s199_s3, 3 }
  0x21   : > { %s578_s2 = sshll.u32 %s1434_s11, 7  ;;  %s87_s7 = ssub.s32 %s1434_s11, %s1436_s21 }
  0x22   : > { %p88_p11 = scmp.eq.s32.totalorder %s87_s7, 0  ;;  %s1096_s27 = scalar_lea.hbm %s1361_s1, %s578_s2 }
  0x23   : > { %s201_s9 = scalar_lea.vmem [#allocation5], %s574_s22  ;;  %p1102_p12 = pnand %p1371_p9, %p1078_p5 }
  0x24   : > { %s221_s5 = sshll.u32 %s201_s9, 4  ;;  %s1111_s2 = scalar_lea.sflag [#allocation6], %s197_s6  ;;  %s1109_s5 = int_to_ptr.vmem [resolvable:$true] %s221_s5 }
  0x25   : > { %s1107_s3 = scalar_select %p88_p11, %s921_s17, %s90_s8  }
  0x26   : > { %s741_s21 = scalar_lea.hbm %s1096_s27, 128  ;;  %p743_p3 = pneg %p1102_p12 }
  0x27   : > { %p742_p13 = scmp.ne.s32.totalorder %s1096_s27, %s741_s21  ;;  %s746_s11 = scalar_lea.hbm %s1361_s1, 256 }
  0x28   : > { %p747_p5 = scmp.lt.u32.totalorder %s1096_s27, %s1361_s1  ;;  %p748_p7 = scmp.lt.u32.totalorder %s746_s11, %s741_s21 }
  0x29   : > { %p744_p4 = pnand %p743_p3, %p742_p13  ;;  %p750_p11 = scmp.lt.u32.totalorder %s741_s21, %s1096_s27 }
  0x2a   : > { %p749_p10 = por %p748_p7, %p747_p5 }
  0x2b   : > { %p745_p6 = pneg %p744_p4 }
  0x2c   : > { %p751_p9 = por %p750_p11, %p749_p10 }
  0x2e   : > { %p752_p1 = pnand %p751_p9, %p745_p6 }
  0x30   : > { %755 = shalt.err (!%p752_p1)
}
  0x31   : > { %s756_s8 = scalar_lea.vmem %s1109_s5, 128  ;;  %s955_s6 = smov [#allocation5]  }
  0x32   : > { %p757_p13 = scmp.ne.s32.totalorder %s1109_s5, %s756_s8  ;;  %s761_s15 = sshll.u32 %s955_s6, 4  ;;  %s762_s15 = int_to_ptr.vmem [resolvable:$false] %s761_s15 }
  0x33   : > { %s763_s26 = scalar_lea.vmem %s762_s15, 256  ;;  %p764_p0 = scmp.lt.s32.totalorder %s1109_s5, %s762_s15 }
  0x34   : > { %p759_p4 = pnand %p757_p13, %p743_p3  ;;  %p765_p5 = scmp.lt.s32.totalorder %s763_s26, %s756_s8 }
  0x36   : > { %p760_p8 = pneg %p759_p4  ;;  %p766_p7 = por %p765_p5, %p764_p0 }
  0x38   : > { %p767_p10 = pnand %p766_p7, %p760_p8 }
  0x3a   : > { %770 = shalt.err (!%p767_p10)
}
  0x3b   : > { %613 = dma.hbm_to_vmem [thread:$0]  (!%p1102_p12), %s1096_s27, 128, %s1109_s5, %s1111_s2  }
  0x3c   : > { %p581_p0 = scmp.ge.s32.totalorder %s953_s25, 1  ;;  %p244_p1 = scmp.lt.s32.totalorder %s953_s25, 5 }
  0x3d   : > { %s35_s9 = ssub.s32 %s949_s24, %s1432_s4  ;;  %s38_s21 = sadd.s32 1, %s933_s20 }
  0x3e   : > { %p1141_p8 = pnand %p581_p0, %p244_p1  ;;  %p36_p9 = scmp.eq.s32.totalorder %s35_s9, 0 }
  0x3f   : > { %p45_p3 = scmp.ne.s32.totalorder %s933_s20, %s929_s19  ;;  %p51_p6 = scmp.ne.s32.totalorder %s929_s19, %s925_s18 }
  0x40   : > { %s1388_s16 = scalar_select %p1141_p8, 1, 0 }
  0x41   : > { %s1153_s22 = scalar_select %p36_p9, %s933_s20, %s38_s21  }
  0x42   : > { %p1389_p11 = scmp.eq.s32.totalorder %s953_s25, 0  ;;  %p1159_p4 = por %p1063_p2, %p51_p6 }
  0x43   : > { %s179_s5 = sand.u32 1, %s933_s20   ;;  %s573_s27 = sshll.u32 %s949_s24, 7 }
  0x44   : > { %p47_p13 = por %p1389_p11, %p45_p3  ;;  %s572_s11 = sshll.u32 %s179_s5, 3 }
  0x45   : > { %s1390_s10 = scalar_select %p1159_p4, 1, 0 }
  0x46   : > { %s1168_s8 = scalar_lea.hbm %s1360_s0, %s573_s27  ;;  %s183_s18 = scalar_lea.vmem [#allocation3], %s572_s11 }
  0x47   : > { %s190_s6 = sshll.u32 %s183_s18, 4  ;;  %p1391_p12 = scmp.lt.s32.totalorder %s953_s25, 4  ;;  %s1176_s6 = int_to_ptr.vmem [resolvable:$true] %s190_s6 }
  0x48   : > { %s180_s26 = scalar_lea.sflag [#allocation4], %s179_s5  ;;  %s771_s9 = scalar_lea.hbm %s1168_s8, 128 }
  0x49   : > { %p1172_p5 = pnand %p1391_p12, %p47_p13  ;;  %p772_p7 = scmp.ne.s32.totalorder %s1168_s8, %s771_s9 }
  0x4a   : > { %s776_s11 = scalar_lea.hbm %s1360_s0, 256  ;;  %p777_p9 = scmp.lt.u32.totalorder %s1168_s8, %s1360_s0 }
  0x4b   : > { %p773_p10 = pneg %p1172_p5  ;;  %p778_p3 = scmp.lt.u32.totalorder %s776_s11, %s771_s9 }
  0x4c   : > { %p780_p11 = scmp.lt.u32.totalorder %s771_s9, %s1168_s8 }
  0x4d   : > { %p774_p0 = pnand %p773_p10, %p772_p7  ;;  %p779_p6 = por %p778_p3, %p777_p9 }
  0x4f   : > { %p775_p1 = pneg %p774_p0  ;;  %p781_p13 = por %p780_p11, %p779_p6 }
  0x51   : > { %p782_p12 = pnand %p781_p13, %p775_p1 }
  0x53   : > { %785 = shalt.err (!%p782_p12)
}
  0x54   : > { %s786_s5 = scalar_lea.vmem %s1176_s6, 128  ;;  %s956_s18 = smov [#allocation3]  }
  0x55   : > { %p787_p7 = scmp.ne.s32.totalorder %s1176_s6, %s786_s5  ;;  %s791_s21 = sshll.u32 %s956_s18, 4  ;;  %s792_s21 = int_to_ptr.vmem [resolvable:$false] %s791_s21 }
  0x56   : > { %s793_s27 = scalar_lea.vmem %s792_s21, 256  ;;  %p794_p8 = scmp.lt.s32.totalorder %s1176_s6, %s792_s21 }
  0x57   : > { %p789_p0 = pnand %p787_p7, %p773_p10  ;;  %p795_p9 = scmp.lt.s32.totalorder %s793_s27, %s786_s5 }
  0x59   : > { %p790_p4 = pneg %p789_p0  ;;  %p796_p3 = por %p795_p9, %p794_p8 }
  0x5b   : > { %p797_p6 = pnand %p796_p3, %p790_p4 }
  0x5d   : > { %800 = shalt.err (!%p797_p6)
}
  0x5e   : > { %610 = dma.hbm_to_vmem [thread:$0]  (!%p1172_p5), %s1168_s8, 128, %s1176_s6, %s180_s26  }
  0x5f   : > { %s1393_s9 = sadd.s32 1, %s945_s23  ;;  %p1394_p8 = scmp.ne.s32.totalorder %s1382_s28, 0 }
  0x60   : > { %s116_s15 = sadd.s32 1, %s909_s14  ;;  %p123_p4 = scmp.ne.s32.totalorder %s909_s14, %s905_s13 }
  0x61   : > { %s1438_s9 = smov (%p1394_p8, %s1393_s9), 0  ;;  %p129_p10 = scmp.ne.s32.totalorder %s905_s13, %s901_s12 }
  0x62   : > { %s113_s11 = ssub.s32 %s945_s23, %s1438_s9  ;;  %p1395_p11 = scmp.eq.s32.totalorder %s953_s25, 0 }
  0x63   : > { %p114_p1 = scmp.eq.s32.totalorder %s113_s11, 0  ;;  %p1220_p12 = por %p129_p10, %p1063_p2 }
  0x64   : > { %p125_p13 = por %p123_p4, %p1395_p11  ;;  %s230_s7 = sand.u32 1, %s909_s14  }
  0x65   : > { %s1396_s29 = scalar_select %p1220_p12, 1, 0 }
  0x66   : > { %s1226_s8 = scalar_select %p114_p1, %s909_s14, %s116_s15  }
  0x67   : > { %s579_s28 = sshll.u32 %s230_s7, 3  ;;  %s580_s6 = sshll.u32 %s945_s23, 7 }
  0x68   : > { %s1397_s18 = sld [smem:[#allocation15_spill]]  ;;  %s232_s12 = scalar_lea.vmem [#allocation7], %s579_s28 }
  0x69   : > { %s239_s30 = sshll.u32 %s232_s12, 4  ;;  %p1399_p2 = scmp.lt.s32.totalorder %s953_s25, 4  ;;  %s240_s30 = int_to_ptr.vmem [resolvable:$true] %s239_s30 }
  0x6b   : > { %p1236_p5 = pnand %p1399_p2, %p125_p13 }
  0x6d   : > { %p803_p0 = pneg %p1236_p5 }
  0x6e   : > { %s1398_s27 = smov %s1397_s18  ;;  %s1232_s21 = scalar_lea.hbm %s1397_s18, %s580_s6 }
  0x6f   : > { %s801_s15 = scalar_lea.hbm %s1232_s21, 128  ;;  %s806_s28 = scalar_lea.hbm %s1398_s27, 256 }
  0x70   : > { %p802_p7 = scmp.ne.s32.totalorder %s1232_s21, %s801_s15  ;;  %p807_p6 = scmp.lt.u32.totalorder %s1232_s21, %s1398_s27 }
  0x71   : > { %p808_p8 = scmp.lt.u32.totalorder %s806_s28, %s801_s15  ;;  %p810_p10 = scmp.lt.u32.totalorder %s801_s15, %s1232_s21 }
  0x72   : > { %p804_p9 = pnand %p803_p0, %p802_p7 }
  0x73   : > { %p809_p4 = por %p808_p8, %p807_p6 }
  0x74   : > { %p805_p3 = pneg %p804_p9 }
  0x75   : > { %p811_p1 = por %p810_p10, %p809_p4 }
  0x77   : > { %p812_p11 = pnand %p811_p1, %p805_p3 }
  0x79   : > { %815 = shalt.err (!%p812_p11)
}
  0x7a   : > { %s816_s18 = scalar_lea.vmem %s240_s30, 128  ;;  %s957_s12 = smov [#allocation7]  }
  0x7b   : > { %p817_p13 = scmp.ne.s32.totalorder %s240_s30, %s816_s18  ;;  %s821_s7 = sshll.u32 %s957_s12, 4  ;;  %s822_s7 = int_to_ptr.vmem [resolvable:$false] %s821_s7 }
  0x7c   : > { %s823_s6 = scalar_lea.vmem %s822_s7, 256  ;;  %p824_p9 = scmp.lt.s32.totalorder %s240_s30, %s822_s7 }
  0x7d   : > { %p819_p2 = pnand %p817_p13, %p803_p0  ;;  %p825_p12 = scmp.lt.s32.totalorder %s823_s6, %s816_s18 }
  0x7f   : > { %p820_p7 = pneg %p819_p2  ;;  %p826_p6 = por %p825_p12, %p824_p9 }
  0x81   : > { %p827_p8 = pnand %p826_p6, %p820_p7 }
  0x83   : > { %830 = shalt.err (!%p827_p8)
}
  0x84   : > { %616 = dma.hbm_to_vmem [thread:$0]  (!%p1236_p5), %s1232_s21, 128, %s240_s30, %s1111_s2  }
  0x85   : > { %p1401_p3 = scmp.ne.s32.totalorder %s1388_s16, 0 }
  0x86   : > { %s250_s15 = sand.u32 (!%p1401_p3), 1, %s929_s19   ;;  %p1402_p0 = scmp.ne.s32.totalorder (!%p1401_p3), %s1390_s10, 0 }
  0x87   : > { %248 = sbr.rel (%p1401_p3) target bundleno = 1029 (0x405), region = 32  ;;  %s1265_s28 = sshll.u32 (!%p1401_p3), %s250_s15, 3 }
  0x88   : > { %s251_s26 = scalar_lea.sflag (!%p1401_p3), [#allocation4], %s250_s15  ;;  %s254_s5 = scalar_lea.vmem (!%p1401_p3), [#allocation3], %s1265_s28 }
  0x8e   : > { %888 = dma.done.wait (%p1402_p0), %s251_s26, 128  }
  0x8f   : > { %890 = vsyncadd (%p1402_p0), %s251_s26, 4294967168  ;;  %s1403_s11 = sadd.s32 4294967295, %s953_s25   ;;  %s1404_s18 = sld [smem:[#allocation11_spill]] }
  0x90   : > { %s1405_s2 = sld [smem:[#allocation14_spill]]  ;;  %s259_s21 = sand.u32 1, %s1403_s11  }
  0x91   : > { %s260_s12 = scalar_lea.sflag [#allocation6], %s259_s21 }
  0x95   : > { %s261_s16 = sand.u32 1, %s1404_s18  }
  0x96   : > { %s1275_s30 = sshll.u32 %s261_s16, 3  ;;  %p1406_p12 = scmp.ne.s32.totalorder %s1405_s2, 0 }
  0x98   : > { %892 = dma.done.wait (%p1406_p12), %s260_s12, 128  }
  0x99   : > { %894 = vsyncadd (%p1406_p12), %s260_s12, 4294967168  ;;  %s270_s10 = sand.u32 1, %s905_s13   ;;  %p1407_p5 = scmp.ne.s32.totalorder %s1396_s29, 0 }
  0x9a   : > { %s584_s6 = sshll.u32 %s270_s10, 3 }
  0x9b   : > { %s272_s15 = scalar_lea.vmem [#allocation7], %s584_s6 }
  0x9c   : > { %896 = dma.done.wait (%p1407_p5), %s260_s12, 128  }
  0x9d   : > { %898 = vsyncadd (%p1407_p5), %s260_s12, 4294967168  ;;  %s1408_s26 = sld [smem:[#allocation13_spill]]  ;;  %s1409_s16 = sld [smem:[#allocation16_spill]] }
  0x9e   : > { %s1410_s7 = sld [smem:[#allocation12_spill]] }
  0xa3   : > { %p317_p4 = scmp.lt.s32.totalorder %s1408_s26, 1 }
  0xa4   : > { %p586_p10 = scmp.ne.s32.totalorder %s1410_s7, 0 }
  0xa5   : > { %s1440_s26 = smov (!%p317_p4, %s1408_s26), 1  ;;  %vm326_vm0 = vcmask (!%p586_p10), 7168   ;;  %v958_v0 = vmov (!%p586_p10), 0.0  }
  0xa6   : > { %s585_s11 = sshll.u32 %s1440_s26, 3  ;;  %325 = sbr.rel (%p586_p10) target bundleno = 173 (0xad), region = 48  ;;  %327 = vst.msk [vmem:[#allocation2] sm:$0xff] (!%p586_p10), %vm326_vm0, %v958_v0 }
  0xa7   : > { %s1292_s2 = scalar_lea.vmem %s1409_s16, %s585_s11 }
  0xad PF: > { %vm330_vm1 = vcmask 261120   ;;  %v337_v1 = vld [vmem:[%s272_s15] sm:$0xff]  ;;  %v959_v7 = vmov 0.0   ;;  %vm960_vm2 = vmmov 0   ;;  %s1411_s29 = sld [smem:[#allocation12_spill]]  ;;  %s1412_s12 = sld [smem:[#allocation13_spill]] }
  0xae   : > { %v328_v2 = vld [vmem:[%s254_s5] sm:$0xff]  ;;  %v338_v3 = vmul.f32 %v337_v1, %v337_v1  ;;  %595 = vmatprep.subr.bf16.mxu0 %v959_v7  ;;  %597 = vmatprep.mubr.msk.bf16.mxu0 %vm960_vm2, %v959_v7 }
  0xaf   : > { %v329_v4 = vmul.f32 %v328_v2, %v328_v2 }
  0xb0   : > { %v339_v5 = vsel %vm330_vm1, %v338_v3, 0.0 }
  0xb1   : > { %340 = vadd.xlane.f32.xlu0 %v339_v5  ;;  %v331_v6 = vsel %vm330_vm1, %v329_v4, 0.0 }
  0xb3   : > { %p588_p1 = scmp.ne.s32.totalorder %s1412_s12, %s1411_s29 }
  0xb4   : > { %v400_v26 = vlaneseq (!%p588_p1)  ;;  %vm407_vm3 = vcmask (!%p588_p1), 64512   ;;  %v404_v31 = vld [vmem:[#allocation2] sm:$0xff] (!%p588_p1)  ;;  %vm412_vm5 = vcmask (!%p588_p1), 7168  }
  0xb5   : > { %332 = vadd.xlane.f32.xlu0 %v331_v6 }
  0xb6   : > { %v401_v27 = vshrl.u32 (!%p588_p1), %v400_v26, 7  ;;  %v403_v28 = vand.u32 (!%p588_p1), 127, %v400_v26 }
  0xb8   : > { %vm405_vm4 = vcmp.eq.s32.totalorder (!%p588_p1), %v401_v27, %v403_v28 }
 0x13e   : > { %v341_v8 = vpop.xlane.xlu0 %340 }
 0x13f   : > { %v342_v9 = vmax.f32 %v341_v8, 1e-24 }
 0x141   : > { %733 = vrsqrt.f32 %v342_v9 }
 0x142   : > { %v333_v10 = vpop.xlane.xlu0 %332 }
 0x143   : > { %v334_v11 = vmax.f32 %v333_v10, 1e-24 }
 0x145   : > { %735 = vrsqrt.f32 %v334_v11 }
 0x14b   : > { %v734_v12 = vpop.eup %733 }
 0x14c   : > { %v344_v13 = vmul.f32 %v734_v12, %v337_v1 }
 0x14e   : > { %v347_v14 = vpack.c.bf16 %v344_v13, %v344_v13 }
 0x14f   : > { %v736_v15 = vpop.eup %735 }
 0x150   : > { %v352_v16 = vsel %vm330_vm1, %v347_v14, 0  ;;  %v336_v17 = vmul.f32 %v736_v15, %v328_v2 }
 0x151   : > { %596 = vmatpush3.bf16.xpose.msra.mxu0 %v352_v16 }
 0x152   : > { %v345_v18 = vmul.f32 2.0, %v336_v17 }
 0x154   : > { %v346_v19 = vpack.c.bf16 %v345_v18, %v345_v18 }
 0x158   : > { %598 = vmatmul.mubr.msk.bf16.vlgmr.msra.gmra.mrb[0].mxu0 %vm330_vm1, %v346_v19 }
 0x22b   : > { %v388_v20 = vpop.f32.mrb[0].mxu0 }
 0x22c   : > { %v394_v21 = vmul.f32 1.442695, %v388_v20  ;;  %v599_v22 = vpop.f32.mrb[1].mxu0 }
 0x22d   : > { %v391_v23 = vpop.f32.mrb[2].mxu0 }
 0x22e   : > { %737 = vpow2.f32 %v394_v21  ;;  %v600_v24 = vpop.f32.mrb[3].mxu0 }
 0x232   : > { %399 = sbr.rel (%p588_p1) target bundleno = 716 (0x2cc), region = 52 }
 0x238   : > { %v738_v25 = vpop.eup %737 }
 0x239   : > { %v406_v29 = vsel %vm405_vm4, 0.0, %v738_v25 }
 0x23a   : > { %v408_v30 = vsel %vm407_vm3, %v406_v29, 0.0 }
 0x23b   : > { %409 = vadd.xlane.f32.xlu0 %v408_v30 }
 0x2c8   : > { %v410_v32 = vpop.xlane.xlu0 %409 }
 0x2c9   : > { %v411_v33 = vadd.f32 %v410_v32, %v404_v31 }
 0x2cb   : > { %413 = vst.msk [vmem:[#allocation2] sm:$0xff] %vm412_vm5, %v411_v33 }
 0x2cc PF: > { %s1413_s7 = sld [smem:[#allocation12_spill]]  ;;  %s1414_s10 = sld [smem:[#allocation13_spill]] }
 0x2d2   : > { %p589_p11 = scmp.eq.s32.totalorder %s1414_s10, %s1413_s7 }
 0x2d3   : > { %vm419_vm6 = vcmask (!%p589_p11), 64512   ;;  %v418_v35 = vld [vmem:[#allocation2] sm:$0xff] (!%p589_p11)  ;;  %vm424_vm7 = vcmask (!%p589_p11), 7168  }
 0x2d4   : > { %417 = sbr.rel (%p589_p11) target bundleno = 870 (0x366), region = 56  ;;  %v420_v34 = vsel (!%p589_p11), %vm419_vm6, %v738_v25, 0.0 }
 0x2d5   : > { %421 = vadd.xlane.f32.xlu0 (!%p589_p11), %v420_v34 }
 0x362   : > { %v422_v36 = vpop.xlane.xlu0 %421 }
 0x363   : > { %v423_v37 = vadd.f32 %v422_v36, %v418_v35 }
 0x365   : > { %425 = vst.msk [vmem:[#allocation2] sm:$0xff] %vm424_vm7, %v423_v37 }
 0x366 PF: > { %s1415_s6 = sld [smem:[#allocation12_spill]] }
 0x36c   : > { %p590_p13 = scmp.ne.s32.totalorder %s1415_s6, 1 }
 0x36d   : > { %v430_v38 = vld [vmem:[%s254_s5] sm:$0xff] (!%p590_p13)  ;;  %s1416_s15 = scalar_lea.vmem (!%p590_p13), [#allocation5], %s1275_s30  ;;  %v437_v42 = vld [vmem:[#allocation2] sm:$0xff] (!%p590_p13)  ;;  %vm441_vm8 = vcmask (!%p590_p13), 7168  }
 0x36e   : > { %429 = sbr.rel (%p590_p13) target bundleno = 1029 (0x405), region = 60  ;;  %v431_v39 = vld [vmem:[%s1416_s15] sm:$0xff] (!%p590_p13)  ;;  %739 = vlog2.f32 (!%p590_p13), %v437_v42 }
 0x36f   : > { %v432_v40 = vmul.f32 (!%p590_p13), %v431_v39, %v430_v38 }
 0x371   : > { %v433_v41 = vsel (!%p590_p13), %vm330_vm1, %v432_v40, 0.0 }
 0x372   : > { %434 = vadd.xlane.f32.xlu0 (!%p590_p13), %v433_v41 }
 0x378   : > { %v740_v43 = vpop.eup %739 }
 0x379   : > { %v439_v44 = vmul.f32 0.6931472, %v740_v43 }
 0x3ff   : > { %v435_v45 = vpop.xlane.xlu0 %434 }
 0x400   : > { %v436_v46 = vmul.f32 2.0, %v435_v45 }
 0x402   : > { %v440_v47 = vsub.f32 %v439_v44, %v436_v46 }
 0x404   : > { %442 = vst.msk [vmem:[%s1292_s2] sm:$0xff] %vm441_vm8, %v440_v47 }
 0x405 PF: > { %s19_s25 = sadd.s32 1, %s953_s25   ;;  %s1418_s15 = sld [smem:[#allocation11_spill]] }
 0x406   : > { %p1313_p2 = scmp.ge.s32.totalorder %s19_s25, 6   ;;  %s1419_s12 = smov %s905_s13 }
 0x407   : > { %s1420_s13 = smov %s909_s14  ;;  %s1421_s14 = smov %s1226_s8 }
 0x408   : > { %s1422_s16 = smov %s921_s17  ;;  %s1423_s17 = smov %s1107_s3 }
 0x409   : > { %s1424_s18 = smov %s929_s19  ;;  %s1425_s19 = smov %s933_s20 }
 0x40a   : > { %s1426_s20 = smov %s1153_s22  ;;  %s1427_s21 = smov %s945_s23 }
 0x40b   : > { %s1428_s22 = smov %s949_s24  ;;  %s1429_s23 = smov %s1438_s9 }
 0x40c   : > { %s1430_s24 = smov %s1432_s4  ;;  %18 = sbr.rel (!%p1313_p2) target bundleno = 13 (0xd), region = 112 }
 0x413   :  { %462 = vsyncpa [#allocation4], 1 }
 0x414   :  { %464 = vsyncpa [#allocation4 + $0x1], 1 }
 0x415   :  { %465 = vsyncpa [#allocation6], 1 }
 0x416   :  { %467 = vsyncpa [#allocation6 + $0x1], 1 }

</bundles_post_ra>
